<compile_context>
chip_gen: v7x
topology: tpu7x:2x2x1
jax: 0.10.0
libtpu: 0.0.40
codegen_flags: <defaults>
</compile_context>

<pallas_src>
import math

import jax
import jax.numpy as jnp
import numpy as np
from jax.experimental import pallas as pl
from jax.experimental.pallas import tpu as pltpu


def _round_up(x, m):
    return ((x + m - 1) // m) * m


_INV_SQRT2 = 1.0 / math.sqrt(2.0)


def _erf(z):
    # Abramowitz & Stegun 7.1.26 rational/exp approximation, max abs error ~1.5e-7.
    a = jnp.abs(z)
    t = 1.0 / (1.0 + 0.3275911 * a)
    poly = t * (0.254829592
                + t * (-0.284496736
                       + t * (1.421413741
                              + t * (-1.453152027
                                     + t * 1.061405429))))
    e = 1.0 - poly * jnp.exp(-a * a)
    return jnp.where(z < 0.0, -e, e)


def _gelu_exact(x):
    # Exact (erf-based) GELU, as in PyTorch's default nn.GELU().
    return 0.5 * x * (1.0 + _erf(x * _INV_SQRT2))


def _fusion_kernel(x_ref, w1_ref, w2_ref, b_ref, o_ref):
    # MXU matmul #1: bf16 (tm, F) @ bf16 (F, H) -> f32 (tm, H); bias add in f32.
    h = jnp.dot(x_ref[...].astype(jnp.bfloat16), w1_ref[...],
                preferred_element_type=jnp.float32)
    h = _gelu_exact(h + b_ref[0:1, :])
    # TODO(synk): nn.Dropout(p=0.3) is identity at inference; a training-mode port
    # would draw the keep-mask in-kernel via pltpu.prng_seed / pltpu.prng_random_bits
    # and scale by 1/(1-p).
    # MXU matmul #2: bf16 (tm, H) @ bf16 (H, H) -> f32, plus bias.
    out = jnp.dot(h.astype(jnp.bfloat16), w2_ref[...],
                  preferred_element_type=jnp.float32) + b_ref[1:2, :]
    o_ref[...] = out.astype(o_ref.dtype)


def high_level_fusion(x, w1, b1, w2, b2, *, tile_m=512):
    """Fused Linear(F->H) -> GELU(exact) -> Dropout(eval) -> Linear(H->H).

    x: (..., F); w1: (F, H); b1: (H,); w2: (H, H); b2: (H,). Returns (..., H) f32.
    """
    lead = x.shape[:-1]
    F = x.shape[-1]
    H = w1.shape[1]

    xm = x.reshape(-1, F)          # metadata reshape only; bf16 cast happens in-kernel
    M = xm.shape[0]

    # ---- choose a sublane-aligned row tile -------------------------------------
    tile_m = max(8, _round_up(int(tile_m), 8))       # guard non-multiple-of-8 tiles
    m_pad8 = _round_up(M, 8)
    if m_pad8 >= 16:
        # Keep >= 2 grid steps so the "parallel" row axis can be split across
        # v7x's two TensorCores instead of collapsing to a single step.
        tile = min(tile_m, _round_up((m_pad8 + 1) // 2, 8))
    else:
        tile = m_pad8
    m_pad = _round_up(M, tile)
    if m_pad != M:                                   # pad only when actually needed
        xm = jnp.pad(xm, ((0, m_pad - M), (0, 0)))

    # Weights fed to the MXU in bf16 (one-time cast; in a real model they would be
    # stored pre-cast).  Biases stay f32 and are packed into one (2, H) block.
    w1b = w1.astype(jnp.bfloat16)
    w2b = w2.astype(jnp.bfloat16)
    biases = jnp.stack([b1, b2]).astype(jnp.float32)     # (2, H)

    grid = (m_pad // tile,)
    cost = pl.CostEstimate(
        flops=2 * m_pad * F * H + 2 * m_pad * H * H,
        transcendentals=m_pad * H,                        # one exp per hidden element
        bytes_accessed=(xm.size * xm.dtype.itemsize
                        + w1b.size * 2 + w2b.size * 2
                        + biases.size * 4 + m_pad * H * 4),
    )

    out = pl.pallas_call(
        _fusion_kernel,
        out_shape=jax.ShapeDtypeStruct((m_pad, H), jnp.float32),
        grid=grid,
        in_specs=[
            pl.BlockSpec((tile, F), lambda i: (i, 0)),    # activations, row-tiled
            pl.BlockSpec((F, H), lambda i: (0, 0)),       # W1 resident (constant idx)
            # TODO(synk): if hidden_dim is scaled up (e.g. 4096), tile W2 over a K
            # grid axis with an f32 accumulator instead of keeping it resident
            # (v7x has only 64 MiB VMEM); single-buffering (pl.Buffered(1)) the
            # grid-invariant weight blocks would also free headroom there.
            pl.BlockSpec((H, H), lambda i: (0, 0)),       # W2 resident
            pl.BlockSpec((2, H), lambda i: (0, 0)),       # [b1; b2] packed
        ],
        out_specs=pl.BlockSpec((tile, H), lambda i: (i, 0)),   # lane-dense (tile, 128)
        compiler_params=pltpu.CompilerParams(
            dimension_semantics=("parallel",),
        ),
        cost_estimate=cost,
    )(xm, w1b, w2b, biases)

    if m_pad != M:
        out = out[:M]
    return out.reshape(*lead, H)


def _reference(x, w1, b1, w2, b2):
    # Mirrors the kernel's numerics (bf16 MXU operands, f32 accumulation, exact
    # erf GELU) with plain XLA ops, for a tight correctness check.
    h = jnp.einsum("...f,fh->...h", x.astype(jnp.bfloat16), w1.astype(jnp.bfloat16),
                   preferred_element_type=jnp.float32) + b1
    h = jax.nn.gelu(h, approximate=False)
    return jnp.einsum("...h,hk->...k", h.astype(jnp.bfloat16), w2.astype(jnp.bfloat16),
                      preferred_element_type=jnp.float32) + b2


if __name__ == "__main__":
    # Small shapes consistent with the module: in_features=32, hidden_dim=128.
    # Flattened rows M = 16 -> two 8-row tiles (exercises the multi-step grid).
    B, S, F, H = 2, 8, 32, 128

    key = jax.random.PRNGKey(0)
    key, kx, kw1, kb1, kw2, kb2 = jax.random.split(key, 6)

    x = jax.random.normal(kx, (B, S, F), dtype=jnp.float32)

    # PyTorch nn.Linear-style init: U(-1/sqrt(fan_in), 1/sqrt(fan_in)).
    bnd1 = 1.0 / math.sqrt(F)
    w1 = jax.random.uniform(kw1, (F, H), jnp.float32, -bnd1, bnd1)
    b1 = jax.random.uniform(kb1, (H,), jnp.float32, -bnd1, bnd1)
    bnd2 = 1.0 / math.sqrt(H)
    w2 = jax.random.uniform(kw2, (H, H), jnp.float32, -bnd2, bnd2)
    b2 = jax.random.uniform(kb2, (H,), jnp.float32, -bnd2, bnd2)

    out = jax.block_until_ready(high_level_fusion(x, w1, b1, w2, b2))
    ref = _reference(x, w1, b1, w2, b2)

    assert out.shape == (B, S, H)
    np.testing.assert_allclose(np.asarray(out), np.asarray(ref), rtol=2e-3, atol=2e-3)
    print("KERNEL_OK")
</pallas_src>

<mosaic_0001>
module attributes {stable_mosaic.version = 11 : i64} {
  func.func @_fusion_kernel(%arg0: i32, %arg1: memref<8x32xf32, #tpu.memory_space<vmem>>, %arg2: memref<32x128xbf16, #tpu.memory_space<vmem>>, %arg3: memref<128x128xbf16, #tpu.memory_space<vmem>>, %arg4: memref<2x128xf32, #tpu.memory_space<vmem>>, %arg5: memref<8x128xf32, #tpu.memory_space<vmem>>) attributes {dimension_semantics = [#tpu.dimension_semantics<parallel>], iteration_bounds = array<i64: 2>, scalar_prefetch = 0 : i64, scratch_operands = 0 : i64, tpu.core_type = #tpu.core_type<tc>, window_params = [{transform_indices = @transform_0, window_bounds = array<i64: 8, 32>}, {pipeline_mode = #tpu.pipeline_mode<synchronous>, transform_indices = @transform_1, window_bounds = array<i64: 32, 128>}, {pipeline_mode = #tpu.pipeline_mode<synchronous>, transform_indices = @transform_2, window_bounds = array<i64: 128, 128>}, {pipeline_mode = #tpu.pipeline_mode<synchronous>, transform_indices = @transform_3, window_bounds = array<i64: 2, 128>}, {transform_indices = @transform_4, window_bounds = array<i64: 8, 128>}]} {
    %c0 = arith.constant 0 : index
    %c0_0 = arith.constant 0 : index
    %0 = vector.load %arg1[%c0, %c0_0] : memref<8x32xf32, #tpu.memory_space<vmem>>, vector<8x32xf32>
    %1 = arith.truncf %0 : vector<8x32xf32> to vector<8x32xbf16>
    %c0_1 = arith.constant 0 : index
    %c0_2 = arith.constant 0 : index
    %2 = vector.load %arg2[%c0_1, %c0_2] : memref<32x128xbf16, #tpu.memory_space<vmem>>, vector<32x128xbf16>
    %cst = arith.constant dense<0.000000e+00> : vector<8x128xf32>
    %3 = tpu.matmul %1, %2, %cst {dimension_numbers = #tpu.dot_dimension_numbers<[1], [0], [0], [1], [0, 0, 1, 1], [], []>} : vector<8x32xbf16>, vector<32x128xbf16>, vector<8x128xf32> -> vector<8x128xf32>
    %c0_3 = arith.constant 0 : index
    %c0_4 = arith.constant 0 : index
    %4 = vector.load %arg4[%c0_3, %c0_4] : memref<2x128xf32, #tpu.memory_space<vmem>>, vector<1x128xf32>
    %5 = vector.broadcast %4 : vector<1x128xf32> to vector<8x128xf32>
    %6 = arith.addf %3, %5 : vector<8x128xf32>
    %cst_5 = arith.constant 5.000000e-01 : f32
    %7 = vector.broadcast %cst_5 : f32 to vector<8x128xf32>
    %8 = arith.mulf %7, %6 : vector<8x128xf32>
    %cst_6 = arith.constant 0.707106769 : f32
    %9 = vector.broadcast %cst_6 : f32 to vector<8x128xf32>
    %10 = arith.mulf %6, %9 : vector<8x128xf32>
    %11 = math.absf %10 : vector<8x128xf32>
    %cst_7 = arith.constant 0.327591091 : f32
    %12 = vector.broadcast %cst_7 : f32 to vector<8x128xf32>
    %13 = arith.mulf %12, %11 : vector<8x128xf32>
    %cst_8 = arith.constant 1.000000e+00 : f32
    %14 = vector.broadcast %cst_8 : f32 to vector<8x128xf32>
    %15 = arith.addf %14, %13 : vector<8x128xf32>
    %cst_9 = arith.constant 1.000000e+00 : f32
    %16 = vector.broadcast %cst_9 : f32 to vector<8x128xf32>
    %17 = arith.divf %16, %15 : vector<8x128xf32>
    %cst_10 = arith.constant 1.06140542 : f32
    %18 = vector.broadcast %cst_10 : f32 to vector<8x128xf32>
    %19 = arith.mulf %17, %18 : vector<8x128xf32>
    %cst_11 = arith.constant -1.45315206 : f32
    %20 = vector.broadcast %cst_11 : f32 to vector<8x128xf32>
    %21 = arith.addf %20, %19 : vector<8x128xf32>
    %22 = arith.mulf %17, %21 : vector<8x128xf32>
    %cst_12 = arith.constant 1.42141378 : f32
    %23 = vector.broadcast %cst_12 : f32 to vector<8x128xf32>
    %24 = arith.addf %23, %22 : vector<8x128xf32>
    %25 = arith.mulf %17, %24 : vector<8x128xf32>
    %cst_13 = arith.constant -0.284496725 : f32
    %26 = vector.broadcast %cst_13 : f32 to vector<8x128xf32>
    %27 = arith.addf %26, %25 : vector<8x128xf32>
    %28 = arith.mulf %17, %27 : vector<8x128xf32>
    %cst_14 = arith.constant 0.254829586 : f32
    %29 = vector.broadcast %cst_14 : f32 to vector<8x128xf32>
    %30 = arith.addf %29, %28 : vector<8x128xf32>
    %31 = arith.mulf %17, %30 : vector<8x128xf32>
    %cst_15 = arith.constant 0.000000e+00 : f32
    %32 = vector.broadcast %cst_15 : f32 to vector<8x128xf32>
    %33 = arith.subf %32, %11 : vector<8x128xf32>
    %34 = arith.mulf %33, %11 : vector<8x128xf32>
    %35 = math.exp %34 : vector<8x128xf32>
    %36 = arith.mulf %31, %35 : vector<8x128xf32>
    %cst_16 = arith.constant 1.000000e+00 : f32
    %37 = vector.broadcast %cst_16 : f32 to vector<8x128xf32>
    %38 = arith.subf %37, %36 : vector<8x128xf32>
    %cst_17 = arith.constant 0.000000e+00 : f32
    %39 = vector.broadcast %cst_17 : f32 to vector<8x128xf32>
    %40 = arith.cmpf olt, %10, %39 : vector<8x128xf32>
    %cst_18 = arith.constant 0.000000e+00 : f32
    %41 = vector.broadcast %cst_18 : f32 to vector<8x128xf32>
    %42 = arith.subf %41, %38 : vector<8x128xf32>
    %43 = arith.select %40, %42, %38 : vector<8x128xi1>, vector<8x128xf32>
    %cst_19 = arith.constant 1.000000e+00 : f32
    %44 = vector.broadcast %cst_19 : f32 to vector<8x128xf32>
    %45 = arith.addf %44, %43 : vector<8x128xf32>
    %46 = arith.mulf %8, %45 : vector<8x128xf32>
    %47 = arith.truncf %46 : vector<8x128xf32> to vector<8x128xbf16>
    %c0_20 = arith.constant 0 : index
    %c0_21 = arith.constant 0 : index
    %48 = vector.load %arg3[%c0_20, %c0_21] : memref<128x128xbf16, #tpu.memory_space<vmem>>, vector<128x128xbf16>
    %cst_22 = arith.constant dense<0.000000e+00> : vector<8x128xf32>
    %49 = tpu.matmul %47, %48, %cst_22 {dimension_numbers = #tpu.dot_dimension_numbers<[1], [0], [0], [1], [0, 0, 1, 1], [], []>} : vector<8x128xbf16>, vector<128x128xbf16>, vector<8x128xf32> -> vector<8x128xf32>
    %c1 = arith.constant 1 : index
    %c0_23 = arith.constant 0 : index
    %50 = vector.load %arg4[%c1, %c0_23] : memref<2x128xf32, #tpu.memory_space<vmem>>, vector<1x128xf32>
    %51 = vector.broadcast %50 : vector<1x128xf32> to vector<8x128xf32>
    %52 = arith.addf %49, %51 : vector<8x128xf32>
    %c0_24 = arith.constant 0 : index
    %c0_25 = arith.constant 0 : index
    %53 = vector.load %arg5[%c0_24, %c0_25] : memref<8x128xf32, #tpu.memory_space<vmem>>, vector<8x128xf32>
    tpu.vector_store %arg5[%c0_24, %c0_25], %52 {strides = array<i32>} : memref<8x128xf32, #tpu.memory_space<vmem>>, vector<8x128xf32>,
    return
  }
  func.func @transform_0(%arg0: i32) -> (i32, i32) {
    %c0_i32 = arith.constant 0 : i32
    %c0_i32_0 = arith.constant 0 : i32
    return %arg0, %c0_i32 : i32, i32
  }
  func.func @transform_1(%arg0: i32) -> (i32, i32) {
    %c0_i32 = arith.constant 0 : i32
    %c0_i32_0 = arith.constant 0 : i32
    %c0_i32_1 = arith.constant 0 : i32
    return %c0_i32, %c0_i32_0 : i32, i32
  }
  func.func @transform_2(%arg0: i32) -> (i32, i32) {
    %c0_i32 = arith.constant 0 : i32
    %c0_i32_0 = arith.constant 0 : i32
    %c0_i32_1 = arith.constant 0 : i32
    return %c0_i32, %c0_i32_0 : i32, i32
  }
  func.func @transform_3(%arg0: i32) -> (i32, i32) {
    %c0_i32 = arith.constant 0 : i32
    %c0_i32_0 = arith.constant 0 : i32
    %c0_i32_1 = arith.constant 0 : i32
    return %c0_i32, %c0_i32_0 : i32, i32
  }
  func.func @transform_4(%arg0: i32) -> (i32, i32) {
    %c0_i32 = arith.constant 0 : i32
    %c0_i32_0 = arith.constant 0 : i32
    return %arg0, %c0_i32 : i32, i32
  }
}

</mosaic_0001>

<bundles_post_ra>
// kernel: tpu_custom_call.1
= control target key start
LH: loop header
LB: loop body
LE: loop exit
PB: predicated region body
PF: predicated region fallthrough
CT: control target
= control target key end

     0   :  { %9 = vsyncpa [#allocation3], 0  ;;  %s1135_s0 = inlined_call_operand.hbm [shape: f32[16,32], index: 0, kind: input, shape index: {}]   ;;  %s1136_s1 = inlined_call_operand.hbm [shape: bf16[32,128], index: 1, kind: input, shape index: {}]   ;;  %s1137_s2 = inlined_call_operand.hbm [shape: bf16[128,128], index: 2, kind: input, shape index: {}]   ;;  %s1138_s3 = inlined_call_operand.vmem [shape: f32[2,128], index: 3, kind: input, shape index: {}]   ;;  %s1139_s4 = inlined_call_operand.hbm [shape: f32[16,128], index: 4, kind: output, shape index: {}]  }
   0x1   :  { %11 = vsyncpa [#allocation3 + $0x1], 0 }
   0x2   :  { %12 = vsyncpa [#allocation6], 0 }
   0x3   :  { %13 = vsyncpa [#allocation4], 0 }
   0x4   :  { %15 = vsyncpa [#allocation4 + $0x1], 0  ;;  %s896_s15 = smov 0   ;;  %s898_s16 = smov 0  }
   0x5   :  { %s900_s17 = smov 0   ;;  %s902_s18 = smov 0  }
   0x6 LB: > { %s917_s19 = sadd.s32 4294967295, %s861_s18   ;;  %s551_s20 = sadd.s32 4294967294, %s861_s18   ;;  %s861_s18 = sphi %s902_s18, %s1159_s18   ;;  %s857_s17 = sphi %s900_s17, %s1158_s17   ;;  %s853_s16 = sphi %s898_s16, %s1157_s16   ;;  %s849_s15 = sphi %s896_s15, %s1156_s15  }
   0x7   : > { %p41_p0 = scmp.ne.s32.totalorder %s853_s16, %s849_s15  ;;  %p1140_p1 = scmp.eq.s32.totalorder %s917_s19, 0 }
   0x8   : > { %p134_p3 = scmp.eq.s32.totalorder %s551_s20, 1  ;;  %p552_p5 = scmp.ge.s32.totalorder %s861_s18, 1 }
   0x9   : > { %p926_p4 = por %p1140_p1, %p41_p0  ;;  %p141_p7 = scmp.lt.s32.totalorder %s861_s18, 3 }
   0xa   : > { %p931_p6 = por %p134_p3, %p41_p0  ;;  %s863_s24 = smov [#allocation5]  }
   0xb   : > { %s1143_s21 = scalar_select %p926_p4, 1, 0 }
   0xc   : > { %s1144_s22 = scalar_select %p931_p6, 1, 0 }
   0xd   : > { %p936_p8 = pnand %p552_p5, %p141_p7  ;;  %s153_s25 = sshll.u32 %s863_s24, 4  ;;  %s940_s25 = int_to_ptr.vmem [resolvable:$true] %s153_s25 }
   0xe   : > { %s864_s27 = smov [#allocation7]   ;;  %s705_s5 = scalar_lea.hbm %s1136_s1, 256 }
   0xf   : > { %p632_p9 = pneg %p936_p8  ;;  %s166_s28 = sshll.u32 %s864_s27, 4  ;;  %s951_s28 = int_to_ptr.vmem [resolvable:$true] %s166_s28 }
  0x10   : > { %p706_p12 = scmp.ne.s32.totalorder %s1136_s1, %s705_s5  ;;  %p712_p5 = scmp.lt.u32.totalorder %s705_s5, %s1136_s1 }
  0x11   : > { %p947_p11 = pnand %p632_p9, %p1140_p1 }
  0x13   : > { %p707_p13 = pneg %p947_p11 }
  0x15   : > { %p708_p0 = pnand %p707_p13, %p706_p12 }
  0x17   : > { %p709_p3 = pneg %p708_p0 }
  0x19   : > { %p714_p7 = pnand %p712_p5, %p709_p3 }
  0x1b   : > { %717 = shalt.err (!%p714_p7)
}
  0x1c   : > { %s718_s10 = scalar_lea.vmem %s940_s25, 256  ;;  %p726_p2 = scmp.lt.s32.totalorder %s940_s25, %s940_s25 }
  0x1d   : > { %p719_p9 = scmp.ne.s32.totalorder %s940_s25, %s718_s10  ;;  %p727_p12 = scmp.lt.s32.totalorder %s718_s10, %s718_s10 }
  0x1f   : > { %p721_p10 = pnand %p719_p9, %p707_p13  ;;  %p728_p0 = por %p727_p12, %p726_p2 }
  0x21   : > { %p722_p1 = pneg %p721_p10 }
  0x23   : > { %p729_p6 = pnand %p728_p0, %p722_p1 }
  0x25   : > { %732 = shalt.err (!%p729_p6)
}
  0x26   : > { %s865_s11 = smov 64   ;;  %s866_s12 = smov 4  }
  0x27   : > { %635 = dma.hbm_to_vmem [thread:$0]  (!%p947_p11), %s1136_s1, 256, %s940_s25, [#allocation6], %s865_s11, %s865_s11, %s866_s12  }
  0x28   : > { %s733_s27 = scalar_lea.hbm %s1137_s2, 1024 }
  0x29   : > { %p734_p2 = scmp.ne.s32.totalorder %s1137_s2, %s733_s27  ;;  %p740_p10 = scmp.lt.u32.totalorder %s733_s27, %s1137_s2 }
  0x2b   : > { %p736_p1 = pnand %p734_p2, %p707_p13 }
  0x2d   : > { %p737_p6 = pneg %p736_p1 }
  0x2f   : > { %p742_p3 = pnand %p740_p10, %p737_p6 }
  0x31   : > { %745 = shalt.err (!%p742_p3)
}
  0x32   : > { %s746_s25 = scalar_lea.vmem %s951_s28, 1024  ;;  %p754_p12 = scmp.lt.s32.totalorder %s951_s28, %s951_s28 }
  0x33   : > { %p747_p5 = scmp.ne.s32.totalorder %s951_s28, %s746_s25  ;;  %p755_p0 = scmp.lt.s32.totalorder %s746_s25, %s746_s25 }
  0x35   : > { %p749_p7 = pnand %p747_p5, %p707_p13  ;;  %p756_p2 = por %p755_p0, %p754_p12 }
  0x37   : > { %p750_p9 = pneg %p749_p7 }
  0x39   : > { %p757_p1 = pnand %p756_p2, %p750_p9 }
  0x3b   : > { %760 = shalt.err (!%p757_p1)
}
  0x3c   : > { %638 = dma.hbm_to_vmem [thread:$0]  (!%p947_p11), %s1137_s2, 1024, %s951_s28, [#allocation6], %s865_s11, %s865_s11, %s866_s12  }
  0x3d   : > { %s1006_s9 = sadd.s32 1, %s861_s18   ;;  %s28_s26 = sadd.s32 1, %s857_s17 }
  0x3e   : > { %s25_s10 = ssub.s32 %s861_s18, %s1006_s9  ;;  %p35_p13 = scmp.ne.s32.totalorder %s857_s17, %s853_s16 }
  0x3f   : > { %p26_p6 = scmp.eq.s32.totalorder %s25_s10, 0  ;;  %p36_p10 = scmp.eq.s32.totalorder %s861_s18, 0 }
  0x40   : > { %p1147_p3 = scmp.eq.s32.totalorder %s917_s19, 1  ;;  %p649_p7 = scmp.lt.s32.totalorder %s861_s18, 2 }
  0x41   : > { %s1022_s14 = scalar_select %p26_p6, %s857_s17, %s28_s26  }
  0x42   : > { %p1016_p5 = por %p1147_p3, %p35_p13  ;;  %p37_p9 = por %p36_p10, %p35_p13 }
  0x43   : > { %s183_s20 = sand.u32 1, %s857_s17   ;;  %s557_s28 = sshll.u32 %s861_s18, 7 }
  0x44   : > { %s1148_s13 = scalar_select %p1016_p5, 1, 0 }
  0x45   : > { %s556_s24 = sshll.u32 %s183_s20, 3  ;;  %s1029_s27 = scalar_lea.hbm %s1135_s0, %s557_s28 }
  0x46   : > { %s187_s29 = scalar_lea.vmem [#allocation2], %s556_s24  ;;  %p1033_p11 = pnand %p649_p7, %p37_p9 }
  0x47   : > { %s194_s30 = sshll.u32 %s187_s29, 4  ;;  %s184_s6 = scalar_lea.sflag [#allocation3], %s183_s20  ;;  %s1031_s30 = int_to_ptr.vmem [resolvable:$true] %s194_s30 }
  0x48   : > { %s761_s25 = scalar_lea.hbm %s1029_s27, 128  ;;  %p763_p0 = pneg %p1033_p11 }
  0x49   : > { %p762_p12 = scmp.ne.s32.totalorder %s1029_s27, %s761_s25  ;;  %s766_s26 = scalar_lea.hbm %s1135_s0, 256 }
  0x4a   : > { %p767_p13 = scmp.lt.u32.totalorder %s1029_s27, %s1135_s0  ;;  %p768_p6 = scmp.lt.u32.totalorder %s766_s26, %s761_s25 }
  0x4b   : > { %p764_p2 = pnand %p763_p0, %p762_p12  ;;  %p770_p3 = scmp.lt.u32.totalorder %s761_s25, %s1029_s27 }
  0x4c   : > { %p769_p10 = por %p768_p6, %p767_p13 }
  0x4d   : > { %p765_p1 = pneg %p764_p2 }
  0x4e   : > { %p771_p7 = por %p770_p3, %p769_p10 }
  0x50   : > { %p772_p9 = pnand %p771_p7, %p765_p1 }
  0x52   : > { %775 = shalt.err (!%p772_p9)
}
  0x53   : > { %s776_s20 = scalar_lea.vmem %s1031_s30, 128  ;;  %s867_s28 = smov [#allocation2]  }
  0x54   : > { %p777_p12 = scmp.ne.s32.totalorder %s1031_s30, %s776_s20  ;;  %s781_s11 = sshll.u32 %s867_s28, 4  ;;  %s782_s11 = int_to_ptr.vmem [resolvable:$false] %s781_s11 }
  0x55   : > { %s783_s12 = scalar_lea.vmem %s782_s11, 256  ;;  %p784_p4 = scmp.lt.s32.totalorder %s1031_s30, %s782_s11 }
  0x56   : > { %p779_p2 = pnand %p777_p12, %p763_p0  ;;  %p785_p13 = scmp.lt.s32.totalorder %s783_s12, %s776_s20 }
  0x58   : > { %p780_p5 = pneg %p779_p2  ;;  %p786_p6 = por %p785_p13, %p784_p4 }
  0x5a   : > { %p787_p10 = pnand %p786_p6, %p780_p5 }
  0x5c   : > { %790 = shalt.err (!%p787_p10)
}
  0x5d   : > { %642 = dma.hbm_to_vmem [thread:$0]  (!%p1033_p11), %s1029_s27, 128, %s1031_s30, %s184_s6  }
  0x5e   : > { %203 = sbr.rel (%p936_p8) target bundleno = 607 (0x25f), region = 36  ;;  %s1065_s29 = sand.u32 (!%p936_p8), 1, %s853_s16  }
  0x5f   : > { %s559_s25 = sshll.u32 (!%p936_p8), %s1065_s29, 3  ;;  %s206_s7 = scalar_lea.sflag (!%p936_p8), [#allocation3], %s1065_s29 }
  0x60   : > { %s209_s8 = scalar_lea.vmem (!%p936_p8), [#allocation2], %s559_s25  ;;  %p1150_p4 = scmp.ne.s32.totalorder (!%p936_p8), %s1143_s21, 0 }
  0x65   : > { %836 = dma.done.wait (%p1150_p4), %s206_s7, 128  }
  0x66   : > { %838 = vsyncadd (%p1150_p4), %s206_s7, 4294967168  ;;  %p1151_p5 = scmp.eq.s32.totalorder %s917_s19, 0 }
  0x68   : > { %840 = dma.done.wait (%p1151_p5), [#allocation6], 1280   ;;  %p1152_p8 = pmov %p1151_p5 }
  0x69   : > { %v868_v0 = vmov 0.0   ;;  %vm869_vm0 = vmmov 0   ;;  %v691_v1 = vld [vmem:[#allocation5] sm:$0xff]   ;;  %v692_v2 = vld [vmem:[#allocation5 + $0x8] sm:$0xff]   ;;  %v243_v3 = vld [vmem:[%s209_s8] sm:$0xff]  ;;  %vm266_vm1 = vcmask 261120  }
  0x6a   : > { %842 = vsyncadd (%p1152_p8), [#allocation6], 4294966016  ;;  %592 = vmatprep.subr.bf16.mxu0 %v868_v0  ;;  %596 = vmatprep.mubr.msk.bf16.mxu0 %vm869_vm0, %v868_v0  ;;  %v244_v4 = vpack.c.bf16 %v243_v3, %v243_v3  ;;  %v693_v5 = vld [vmem:[#allocation7] sm:$0xff]   ;;  %v694_v6 = vld [vmem:[#allocation7 + $0x8] sm:$0xff]   ;;  %s577_s5 = sshll.u32 %s917_s19, 7  ;;  %s241_s6 = scalar_lea.vmem [#allocation8], %s559_s25 }
  0x6b   : > { %600 = vmatprep.subr.bf16.mxu1 %v868_v0  ;;  %616 = vmatprep.mubr.msk.bf16.mxu1 %vm869_vm0, %v868_v0  ;;  %v695_v7 = vld [vmem:[#allocation7 + $0x10] sm:$0xff]   ;;  %v696_v8 = vld [vmem:[#allocation7 + $0x18] sm:$0xff]   ;;  %v697_v9 = vld [vmem:[#allocation7 + $0x20] sm:$0xff]   ;;  %s462_s26 = sshll.u32 %s241_s6, 4  ;;  %s1091_s20 = scalar_lea.hbm %s1139_s4, %s577_s5  ;;  %s1093_s26 = int_to_ptr.vmem [resolvable:$true] %s462_s26 }
  0x6c   : > { %593 = vmatpush3.bf16.msra.mxu0 %v691_v1  ;;  %601 = vmatpush3.bf16.msra.mxu1 %v693_v5  ;;  %v698_v10 = vld [vmem:[#allocation7 + $0x28] sm:$0xff]   ;;  %v699_v11 = vld [vmem:[#allocation7 + $0x30] sm:$0xff]   ;;  %v700_v12 = vld [vmem:[#allocation7 + $0x38] sm:$0xff]   ;;  %s449_s19 = scalar_lea.sflag [#allocation4], %s1065_s29  ;;  %s791_s28 = scalar_lea.vmem %s1093_s26, 128 }
  0x6d   : > { %594 = vmatprep.subr.bf16.mxu0 %v868_v0  ;;  %602 = vmatprep.subr.bf16.mxu1 %v868_v0  ;;  %v563_v13 = vld [vmem:[%s1138_s3] ss:$0 sm:$0xff]  ;;  %v567_v45 = vld [vmem:[%s1138_s3 + $0x1] ss:$0 sm:$0xff]  ;;  %p792_p11 = scmp.ne.s32.totalorder %s1093_s26, %s791_s28  ;;  %p1153_p0 = scmp.ne.s32.totalorder %s1148_s13, 0 }
  0x6e   : > { %s870_s11 = smov [#allocation8]  }
  0x6f   : > { %p793_p1 = pnand %p792_p11, %p1153_p0  ;;  %s795_s12 = sshll.u32 %s870_s11, 4  ;;  %s796_s12 = int_to_ptr.vmem [resolvable:$false] %s795_s12 }
  0x70   : > { %595 = vmatpush3.bf16.msra.mxu0 %v692_v2  ;;  %603 = vmatpush3.bf16.msra.mxu1 %v694_v6  ;;  %s797_s25 = scalar_lea.vmem %s796_s12, 256  ;;  %p798_p7 = scmp.lt.s32.totalorder %s1093_s26, %s796_s12 }
  0x71   : > { %604 = vmatprep.subr.bf16.mxu1 %v868_v0  ;;  %p794_p3 = pneg %p793_p1  ;;  %p799_p9 = scmp.lt.s32.totalorder %s797_s25, %s791_s28 }
  0x73   : > { %597 = vmatmul.mubr.msk.bf16.vlgmr.msra.gmra.mrb[0].mxu0 %vm266_vm1, %v244_v4  ;;  %p800_p12 = por %p799_p9, %p798_p7 }
  0x74   : > { %605 = vmatpush3.bf16.msra.mxu1 %v695_v7 }
  0x75   : > { %606 = vmatprep.subr.bf16.mxu1 %v868_v0  ;;  %p801_p2 = pnand %p800_p12, %p794_p3 }
  0x78   : > { %607 = vmatpush3.bf16.msra.mxu1 %v696_v8 }
  0x79   : > { %608 = vmatprep.subr.bf16.mxu1 %v868_v0 }
  0x7c   : > { %609 = vmatpush3.bf16.msra.mxu1 %v697_v9 }
  0x7d   : > { %610 = vmatprep.subr.bf16.mxu1 %v868_v0 }
  0x80   : > { %611 = vmatpush3.bf16.msra.mxu1 %v698_v10 }
  0x81   : > { %612 = vmatprep.subr.bf16.mxu1 %v868_v0 }
  0x84   : > { %613 = vmatpush3.bf16.msra.mxu1 %v699_v11 }
  0x85   : > { %614 = vmatprep.subr.bf16.mxu1 %v868_v0 }
  0x88   : > { %615 = vmatpush3.bf16.msra.mxu1 %v700_v12 }
 0x146   : > { %v304_v14 = vpop.f32.mrb[0].mxu0 }
 0x147   : > { %v305_v15 = vadd.f32 %v563_v13, %v304_v14  ;;  %v598_v16 = vpop.f32.mrb[1].mxu0 }
 0x148   : > { %v307_v17 = vpop.f32.mrb[2].mxu0 }
 0x149   : > { %v311_v18 = vmul.f32 0.70710677, %v305_v15  ;;  %v599_v19 = vpop.f32.mrb[3].mxu0  ;;  %v310_v41 = vmul.f32 0.5, %v305_v15 }
 0x14b   : > { %v312_v20 = vand.u32 2147483647, %v311_v18  ;;  %vm332_vm2 = vcmp.lt.f32.partialorder %v311_v18, 0.0 }
 0x14d   : > { %v313_v21 = vmul.f32 0.3275911, %v312_v20  ;;  %v326_v23 = vsub.f32 0.0, %v312_v20 }
 0x14f   : > { %v314_v22 = vadd.f32 1.0, %v313_v21  ;;  %v327_v25 = vmul.f32 %v326_v23, %v312_v20 }
 0x151   : > { %701 = vrcp.f32 %v314_v22  ;;  %v328_v28 = vmul.f32 1.442695, %v327_v25 }
 0x153   : > { %703 = vpow2.f32 %v328_v28 }
 0x15b   : > { %v702_v24 = vpop.eup %701 }
 0x15c   : > { %v317_v26 = vmul.f32 1.0614054, %v702_v24 }
 0x15d   : > { %v704_v36 = vpop.eup %703 }
 0x15e   : > { %v318_v27 = vadd.f32 -1.4531521, %v317_v26 }
 0x160   : > { %v319_v29 = vmul.f32 %v702_v24, %v318_v27 }
 0x162   : > { %v320_v30 = vadd.f32 1.4214138, %v319_v29 }
 0x164   : > { %v321_v31 = vmul.f32 %v702_v24, %v320_v30 }
 0x166   : > { %v322_v32 = vadd.f32 -0.28449672, %v321_v31 }
 0x168   : > { %v323_v33 = vmul.f32 %v702_v24, %v322_v32 }
 0x16a   : > { %v324_v34 = vadd.f32 0.2548296, %v323_v33 }
 0x16c   : > { %v325_v35 = vmul.f32 %v702_v24, %v324_v34 }
 0x16e   : > { %v330_v37 = vmul.f32 %v704_v36, %v325_v35 }
 0x170   : > { %v331_v38 = vsub.f32 1.0, %v330_v37 }
 0x172   : > { %v333_v39 = vsub.f32 0.0, %v331_v38 }
 0x174   : > { %v334_v40 = vsel %vm332_vm2, %v333_v39, %v331_v38 }
 0x175   : > { %v335_v42 = vadd.f32 1.0, %v334_v40 }
 0x177   : > { %v336_v43 = vmul.f32 %v335_v42, %v310_v41 }
 0x179   : > { %v337_v44 = vpack.c.bf16 %v336_v43, %v336_v43 }
 0x17b   : > { %617 = vmatmul.mubr.bf16.vlgmr.msra.gmra.mrb[0].mxu1 %v337_v44 }
 0x24e   : > { %v441_v46 = vpop.f32.mrb[0].mxu1 }
 0x24f   : > { %v442_v47 = vadd.f32 %v567_v45, %v441_v46  ;;  %v618_v48 = vpop.f32.mrb[1].mxu1 }
 0x250   : > { %v444_v49 = vpop.f32.mrb[2].mxu1 }
 0x251   : > { %447 = vst [vmem:[%s241_s6] sm:$0xff] %v442_v47  ;;  %v619_v50 = vpop.f32.mrb[3].mxu1 }
 0x252   : > { %804 = shalt.err (!%p801_p2)
}
 0x253   : > { %s805_s29 = scalar_lea.hbm %s1091_s20, 128  ;;  %s809_s21 = scalar_lea.hbm %s1139_s4, 256 }
 0x254   : > { %p806_p13 = scmp.ne.s32.totalorder %s1091_s20, %s805_s29  ;;  %p810_p4 = scmp.lt.u32.totalorder %s1091_s20, %s1139_s4 }
 0x255   : > { %p811_p5 = scmp.lt.u32.totalorder %s809_s21, %s805_s29  ;;  %p813_p11 = scmp.lt.u32.totalorder %s805_s29, %s1091_s20 }
 0x256   : > { %p807_p6 = pnand %p806_p13, %p1153_p0 }
 0x257   : > { %p812_p8 = por %p811_p5, %p810_p4 }
 0x258   : > { %p808_p10 = pneg %p807_p6 }
 0x259   : > { %p814_p1 = por %p813_p11, %p812_p8 }
 0x25b   : > { %p815_p3 = pnand %p814_p1, %p808_p10 }
 0x25d   : > { %818 = shalt.err (!%p815_p3)
}
 0x25e   : > { %630 = dma.vmem_to_hbm [thread:$0]  (%p1153_p0), %s1093_s26, 128, %s1091_s20, %s449_s19  }
 0x25f PF: > { %s474_s30 = sand.u32 1, %s849_s15   ;;  %p1154_p7 = scmp.ne.s32.totalorder %s1144_s22, 0 }
 0x260   : > { %p1155_p9 = scmp.ge.s32.totalorder %s861_s18, 2  ;;  %s475_s5 = scalar_lea.sflag [#allocation4], %s474_s30 }
 0x262   : > { %p644_p12 = pnand %p1155_p9, %p1154_p7 }
 0x264   : > { %844 = dma.done.wait (!%p644_p12), %s475_s5, 128  }
 0x265   : > { %846 = vsyncadd (!%p644_p12), %s475_s5, 4294967168  ;;  %p18_p2 = scmp.ge.s32.totalorder %s1006_s9, 4   ;;  %s1156_s15 = smov %s853_s16 }
 0x266   : > { %s1157_s16 = smov %s857_s17  ;;  %s1158_s17 = smov %s1022_s14 }
 0x267   : > { %s1159_s18 = smov %s1006_s9  ;;  %20 = sbr.rel (!%p18_p2) target bundleno = 6 (0x6), region = 89 }
 0x26e   :  { %480 = vsyncpa [#allocation3], 1 }
 0x26f   :  { %482 = vsyncpa [#allocation3 + $0x1], 1 }
 0x270   :  { %483 = vsyncpa [#allocation6], 1 }
 0x271   :  { %484 = vsyncpa [#allocation4], 1 }
 0x272   :  { %486 = vsyncpa [#allocation4 + $0x1], 1 }

</bundles_post_ra>
